<compile_context>
chip_gen: v5e
topology: v5e:2x2
jax: 0.10.0
libtpu: 0.0.40
codegen_flags: <defaults>
</compile_context>

<pallas_src>
import functools
import math

import jax
import jax.numpy as jnp
from jax.experimental import pallas as pl
from jax.experimental.pallas import tpu as pltpu


def _round_up(x: int, m: int) -> int:
    return ((x + m - 1) // m) * m


def _rmsnorm_kernel(x_ref, w_ref, o_ref, *, eps: float, fold: int, hidden: int):
    # x_ref: (block_rows, fold*hidden)   w_ref: (8, fold*hidden) f32
    x = x_ref[...].astype(jnp.float32)
    block_rows = x.shape[0]
    heff = fold * hidden

    if fold == 1:
        inv = jax.lax.rsqrt(jnp.mean(x * x, axis=-1, keepdims=True) + eps)
        y = x * inv
    else:
        # `fold` original rows share the lane axis of one folded row.  Recover
        # per-original-row sums of squares with a block-diagonal 0/1 selector
        # (built from iota + range compares: no integer division, no
        # lane-splitting reshape).
        j = jax.lax.broadcasted_iota(jnp.int32, (heff, fold), 0)
        c = jax.lax.broadcasted_iota(jnp.int32, (heff, fold), 1)
        sel = ((j >= c * hidden) & (j < (c + 1) * hidden)).astype(jnp.float32)
        ssq = jnp.dot(x * x, sel, precision=jax.lax.Precision.HIGHEST,
                      preferred_element_type=jnp.float32)            # (R, fold)
        inv = jax.lax.rsqrt(ssq * (1.0 / hidden) + eps)               # (R, fold)
        inv_full = jnp.dot(inv, sel.T, precision=jax.lax.Precision.HIGHEST,
                           preferred_element_type=jnp.float32)        # (R, heff)
        y = x * inv_full

    w = w_ref[...]                                                    # (8, heff) f32
    if block_rows % 8 == 0:
        # Sublane-replicated weight: every 8-row group of x reuses the same
        # weight vregs (broadcast only over the leading, untiled dim).
        y = (y.reshape(block_rows // 8, 8, heff) * w[None]).reshape(block_rows, heff)
    else:
        # Tiny-block fallback (block_rows < 8); perf-irrelevant here.
        y = y * w[0:1, :]
    o_ref[...] = y.astype(o_ref.dtype)


def _vmem_limit_cap_bytes() -> int:
    # ~0.75x of physical VMEM (v5e/v6e: 128 MiB -> 96 MiB, v7x: 64 -> 48 MiB),
    # leaving headroom for compiler scratch, semaphores and pipeline buffers.
    try:
        cap = int(pltpu.get_tpu_info().vmem_capacity_bytes)
        return max((cap * 3) // 4, 16 * 1024 * 1024)
    except Exception:
        return 48 * 1024 * 1024


def _choose_block_rows(rows: int, hidden_eff: int, in_bytes: int) -> int:
    row_bytes = hidden_eff * in_bytes
    # ~4 MiB input block: mem-bound kernels reach ~85-86% of HBM roofline at
    # 1-4 MiB tiles; bigger blocks only burn VMEM headroom.
    br = (4 * 1024 * 1024) // max(row_bytes, 1)
    br = max((min(br, 1024) // 8) * 8, 8)
    if br >= rows:
        return rows                    # single block == full dim (always legal)
    # Prefer >= 8 grid steps (>= 2 per v7x TensorCore keeps double buffering;
    # extra steps smooth ragged-tail load imbalance) as long as blocks stay
    # >= ~512 KiB (still at roofline) and >= 8 rows.
    floor_rows = max(8, min(br, ((512 * 1024) // max(row_bytes, 1) // 8) * 8))
    while br > floor_rows and pl.cdiv(rows, br) < 8:
        br = max(((br // 2) // 8) * 8, floor_rows)
    return br


def rmsnorm(hidden_states: jax.Array, weight: jax.Array, eps: float = 1e-5,
            block_rows: int | None = None) -> jax.Array:
    """RMSNorm over the last axis of `hidden_states` (any leading shape)."""
    orig_shape = hidden_states.shape
    hidden = int(orig_shape[-1])
    rows = int(math.prod(orig_shape[:-1]))
    if rows == 0 or hidden == 0:
        return hidden_states

    # Lane-density fold: if hidden is not a multiple of 128 lanes, fold `fold`
    # consecutive rows into the lane axis so every DMA/store is full-lane.
    fold = 1
    if hidden % 128 != 0:
        cand = 128 // math.gcd(hidden, 128)
        if cand > 1 and rows % cand == 0:
            fold = cand
    rows_eff = rows // fold
    heff = hidden * fold

    x2d = hidden_states.reshape(rows_eff, heff)
    # Cast the (tiny) weight to f32 once, tile it to the folded lane layout and
    # replicate across 8 sublanes so the in-kernel weight block is vreg-dense.
    w_f32 = weight.astype(jnp.float32).reshape(-1)
    if fold > 1:
        w_f32 = jnp.tile(w_f32, fold)
    w_blk = jnp.broadcast_to(w_f32[None, :], (8, heff))

    in_bytes = hidden_states.dtype.itemsize
    out_bytes = in_bytes

    if block_rows is None:
        block_rows = _choose_block_rows(rows_eff, heff, in_bytes)
    block_rows = max(1, min(int(block_rows), rows_eff))

    grid = (pl.cdiv(rows_eff, block_rows),)

    # dtype-aware live-VMEM estimate: double-buffered in/out blocks in native
    # dtype, a single-buffered f32 upcast temp only for sub-32-bit inputs,
    # plus the 8-sublane replicated f32 weight.
    temp_bytes = 0 if in_bytes >= 4 else 4
    live_bytes = (block_rows * heff * (2 * in_bytes + 2 * out_bytes + temp_bytes)
                  + 8 * heff * 4)
    vmem_limit = min(max(int(live_bytes * 1.5), 16 * 1024 * 1024),
                     _vmem_limit_cap_bytes())

    cost = pl.CostEstimate(
        flops=3 * rows * hidden,
        transcendentals=rows,
        bytes_accessed=rows * hidden * (in_bytes + out_bytes) + hidden * 4,
    )

    out = pl.pallas_call(
        functools.partial(_rmsnorm_kernel, eps=float(eps), fold=fold, hidden=hidden),
        out_shape=jax.ShapeDtypeStruct((rows_eff, heff), hidden_states.dtype),
        grid_spec=pltpu.PrefetchScalarGridSpec(
            num_scalar_prefetch=0,
            grid=grid,
            in_specs=[
                pl.BlockSpec((block_rows, heff), lambda i: (i, 0)),
                pl.BlockSpec((8, heff), lambda i: (0, 0)),
            ],
            out_specs=pl.BlockSpec((block_rows, heff), lambda i: (i, 0)),
        ),
        compiler_params=pltpu.CompilerParams(
            dimension_semantics=("parallel",),
            vmem_limit_bytes=vmem_limit,
        ),
        cost_estimate=cost,
    )(x2d, w_blk)

    return out.reshape(orig_shape)


def rmsnorm_reference(hidden_states, weight, eps=1e-5):
    x = hidden_states.astype(jnp.float32)
    variance = jnp.mean(x * x, axis=-1, keepdims=True)
    normed = x * jax.lax.rsqrt(variance + eps)
    return (weight.astype(jnp.float32) * normed).astype(hidden_states.dtype)


if __name__ == "__main__":
    # Test 1: module-sized small shape (seq=8, batch=2, hidden=32), f32.
    # hidden=32 is not a multiple of 128 -> exercises the lane-fold path.
    key = jax.random.PRNGKey(0)
    seq, batch, hidden = 8, 2, 32
    x1 = jax.random.normal(key, (seq, batch, hidden), dtype=jnp.float32)
    w1 = jnp.ones((hidden,), dtype=jnp.float32)   # module init: ones(normalized_shape)
    o1 = jax.block_until_ready(rmsnorm(x1, w1, eps=1e-5))
    r1 = rmsnorm_reference(x1, w1, eps=1e-5)
    assert o1.shape == x1.shape and o1.dtype == x1.dtype
    assert jnp.allclose(o1, r1, atol=1e-5, rtol=1e-5)

    # Test 2: ragged row count (15) + hidden not a multiple of 128, with a
    # forced 2-step grid so the partial tail block / masked stores run.
    x2 = jax.random.normal(jax.random.PRNGKey(1), (5, 3, 96), dtype=jnp.float32)
    w2 = 1.0 + 0.1 * jax.random.normal(jax.random.PRNGKey(2), (96,), dtype=jnp.float32)
    o2 = jax.block_until_ready(rmsnorm(x2, w2, eps=1e-5, block_rows=8))
    r2 = rmsnorm_reference(x2, w2, eps=1e-5)
    assert jnp.allclose(o2, r2, atol=1e-5, rtol=1e-5)

    # Test 3: bf16 input, lane-dense hidden (128), fold==1 fast path with the
    # sublane-replicated weight multiply.
    x3 = jax.random.normal(jax.random.PRNGKey(3), (2, 8, 128), dtype=jnp.bfloat16)
    w3 = jnp.ones((128,), dtype=jnp.bfloat16)
    o3 = jax.block_until_ready(rmsnorm(x3, w3, eps=1e-5))
    r3 = rmsnorm_reference(x3, w3, eps=1e-5)
    assert o3.dtype == jnp.bfloat16
    assert jnp.allclose(o3.astype(jnp.float32), r3.astype(jnp.float32),
                        atol=2e-2, rtol=2e-2)

    print("KERNEL_OK")
</pallas_src>

<mosaic_0001>
module attributes {stable_mosaic.version = 11 : i64} {
  func.func @_rmsnorm_kernel(%arg0: i32, %arg1: memref<4x128xf32, #tpu.memory_space<vmem>>, %arg2: memref<8x128xf32, #tpu.memory_space<vmem>>, %arg3: memref<4x128xf32, #tpu.memory_space<vmem>>) attributes {dimension_semantics = [#tpu.dimension_semantics<parallel>], iteration_bounds = array<i64: 1>, scalar_prefetch = 0 : i64, scratch_operands = 0 : i64, tpu.core_type = #tpu.core_type<tc>, window_params = [{transform_indices = @transform_0, window_bounds = array<i64: 4, 128>}, {pipeline_mode = #tpu.pipeline_mode<synchronous>, transform_indices = @transform_1, window_bounds = array<i64: 8, 128>}, {transform_indices = @transform_2, window_bounds = array<i64: 4, 128>}]} {
    %c0 = arith.constant 0 : index
    %c0_0 = arith.constant 0 : index
    %0 = vector.load %arg1[%c0, %c0_0] : memref<4x128xf32, #tpu.memory_space<vmem>>, vector<4x128xf32>
    %1 = tpu.iota {dimensions = array<i32: 0>} : vector<128x4xi32>
    %2 = tpu.iota {dimensions = array<i32: 1>} : vector<128x4xi32>
    %c32_i32 = arith.constant 32 : i32
    %3 = vector.broadcast %c32_i32 : i32 to vector<128x4xi32>
    %4 = arith.muli %2, %3 : vector<128x4xi32>
    %5 = arith.cmpi sge, %1, %4 : vector<128x4xi32>
    %c1_i32 = arith.constant 1 : i32
    %6 = vector.broadcast %c1_i32 : i32 to vector<128x4xi32>
    %7 = arith.addi %2, %6 : vector<128x4xi32>
    %c32_i32_1 = arith.constant 32 : i32
    %8 = vector.broadcast %c32_i32_1 : i32 to vector<128x4xi32>
    %9 = arith.muli %7, %8 : vector<128x4xi32>
    %10 = arith.cmpi slt, %1, %9 : vector<128x4xi32>
    %11 = arith.andi %5, %10 : vector<128x4xi1>
    %12 = arith.extui %11 : vector<128x4xi1> to vector<128x4xi32>
    %13 = arith.sitofp %12 : vector<128x4xi32> to vector<128x4xf32>
    %14 = arith.mulf %0, %0 : vector<4x128xf32>
    %cst = arith.constant dense<0.000000e+00> : vector<4x4xf32>
    %15 = tpu.matmul %14, %13, %cst {dimension_numbers = #tpu.dot_dimension_numbers<[1], [0], [0], [1], [0, 0, 1, 1], [], []>, precision = #tpu.contract_precision<fp32>} : vector<4x128xf32>, vector<128x4xf32>, vector<4x4xf32> -> vector<4x4xf32>
    %cst_2 = arith.constant 3.125000e-02 : f32
    %16 = vector.broadcast %cst_2 : f32 to vector<4x4xf32>
    %17 = arith.mulf %15, %16 : vector<4x4xf32>
    %cst_3 = arith.constant 9.99999974E-6 : f32
    %18 = vector.broadcast %cst_3 : f32 to vector<4x4xf32>
    %19 = arith.addf %17, %18 : vector<4x4xf32>
    %20 = math.rsqrt %19 : vector<4x4xf32>
    %21 = tpu.transpose %13, [1, 0] : vector<128x4xf32> -> vector<4x128xf32>
    %cst_4 = arith.constant dense<0.000000e+00> : vector<4x128xf32>
    %22 = tpu.matmul %20, %21, %cst_4 {dimension_numbers = #tpu.dot_dimension_numbers<[1], [0], [0], [1], [0, 0, 1, 1], [], []>, precision = #tpu.contract_precision<fp32>} : vector<4x4xf32>, vector<4x128xf32>, vector<4x128xf32> -> vector<4x128xf32>
    %23 = arith.mulf %0, %22 : vector<4x128xf32>
    %c0_5 = arith.constant 0 : index
    %c0_6 = arith.constant 0 : index
    %24 = vector.load %arg2[%c0_5, %c0_6] : memref<8x128xf32, #tpu.memory_space<vmem>>, vector<8x128xf32>
    %25 = vector.extract_strided_slice %24 {offsets = [0, 0], sizes = [1, 128], strides = [1, 1]} : vector<8x128xf32> to vector<1x128xf32>
    %26 = vector.broadcast %25 : vector<1x128xf32> to vector<4x128xf32>
    %27 = arith.mulf %23, %26 : vector<4x128xf32>
    %c0_7 = arith.constant 0 : index
    %c0_8 = arith.constant 0 : index
    %28 = vector.load %arg3[%c0_7, %c0_8] : memref<4x128xf32, #tpu.memory_space<vmem>>, vector<4x128xf32>
    tpu.vector_store %arg3[%c0_7, %c0_8], %27 {strides = array<i32>} : memref<4x128xf32, #tpu.memory_space<vmem>>, vector<4x128xf32>,
    return
  }
  func.func @transform_0(%arg0: i32) -> (i32, i32) {
    %c0_i32 = arith.constant 0 : i32
    %c0_i32_0 = arith.constant 0 : i32
    return %arg0, %c0_i32 : i32, i32
  }
  func.func @transform_1(%arg0: i32) -> (i32, i32) {
    %c0_i32 = arith.constant 0 : i32
    %c0_i32_0 = arith.constant 0 : i32
    %c0_i32_1 = arith.constant 0 : i32
    return %c0_i32, %c0_i32_0 : i32, i32
  }
  func.func @transform_2(%arg0: i32) -> (i32, i32) {
    %c0_i32 = arith.constant 0 : i32
    %c0_i32_0 = arith.constant 0 : i32
    return %arg0, %c0_i32 : i32, i32
  }
}

</mosaic_0001>

<bundles_post_ra>
// kernel: tpu_custom_call.1
= control target key start
LH: loop header
LB: loop body
LE: loop exit
PB: predicated region body
PF: predicated region fallthrough
CT: control target
= control target key end

     0   :  { %7 = vsyncpa [#allocation3], 0  ;;  %s1971_s0 = inlined_call_operand.hbm [shape: f32[4,128], index: 0, kind: input, shape index: {}]   ;;  %s1972_s1 = inlined_call_operand.hbm [shape: f32[8,128], index: 1, kind: input, shape index: {}]   ;;  %s1973_s2 = inlined_call_operand.hbm [shape: f32[4,128], index: 2, kind: output, shape index: {}]  }
   0x1   :  { %8 = vsyncpa [#allocation6], 0 }
   0x2   :  { %9 = vsyncpa [#allocation4], 0  ;;  %s15_s11 = sshll.u32 %s1971_s0, 4  ;;  %s1110_s12 = smov [#allocation2]   ;;  %s16_s11 = int_to_ptr.hbm [resolvable:$true] %s15_s11 }
   0x3   :  { %s17_s13 = sshll.u32 %s1110_s12, 4  ;;  %s26_s16 = sshll.u32 %s1972_s1, 4  ;;  %s18_s13 = int_to_ptr.vmem [resolvable:$true] %s17_s13  ;;  %s27_s16 = int_to_ptr.hbm [resolvable:$true] %s26_s16 }
   0x4   :  { %20 = dma.hbm_to_vmem [thread:$0]  %s16_s11, 64, %s18_s13, [#allocation3]  }
   0x5   :  { %s1111_s17 = smov [#allocation5]  }
   0x6   :  { %s28_s18 = sshll.u32 %s1111_s17, 4  ;;  %s29_s18 = int_to_ptr.vmem [resolvable:$true] %s28_s18 }
   0x7   :  { %31 = dma.hbm_to_vmem [thread:$0]  %s27_s16, 128, %s29_s18, [#allocation6]  }
   0x8   :  { %1104 = dma.done.wait [#allocation3], 64  }
   0x9   :  { %1105 = vsyncadd [#allocation3], 4294967232  ;;  %v41_v0 = vlaneseq }
   0xa   :  { %1106 = dma.done.wait [#allocation6], 128  }
   0xb   :  { %1107 = vsyncadd [#allocation6], 4294967168  ;;  %v1136_v1 = vshrl.u32 %v41_v0, 7  ;;  %v59_v2 = vand.u32 127, %v41_v0  ;;  %v1112_v14 = vmov 0.0   ;;  %v1113_v16 = vmov 1.0  }
   0xc   :  { %v2005_v45 = vmov 0  ;;  %v2007_v51 = vmov 0  ;;  %v2009_v63 = vmov 0  ;;  %s1114_s0 = smov [#allocation7]   ;;  %s902_s21 = sshll.u32 %s1973_s2, 4  ;;  %s903_s21 = int_to_ptr.hbm [resolvable:$true] %s902_s21 }
   0xd   :  { %v57_v3 = vadd.s32 120, %v1136_v1  ;;  %v1139_v4 = vmul.u32 32, %v59_v2  ;;  %v77_v5 = vadd.s32 1, %v59_v2  ;;  %v56_v6 = vadd.s32 112, %v1136_v1  ;;  %s900_s1 = sshll.u32 %s1114_s0, 4  ;;  %s901_s1 = int_to_ptr.vmem [resolvable:$true] %s900_s1 }
   0xe   :  { %v55_v7 = vadd.s32 104, %v1136_v1  ;;  %v54_v8 = vadd.s32 96, %v1136_v1  ;;  %v53_v9 = vadd.s32 88, %v1136_v1  ;;  %v52_v10 = vadd.s32 80, %v1136_v1 }
   0xf   :  { %vm76_vm0 = vcmp.ge.s32.totalorder %v57_v3, %v1139_v4  ;;  %v1147_v11 = vmul.u32 32, %v77_v5  ;;  %vm75_vm1 = vcmp.ge.s32.totalorder %v56_v6, %v1139_v4  ;;  %v51_v12 = vadd.s32 72, %v1136_v1 }
  0x10   :  { %vm74_vm2 = vcmp.ge.s32.totalorder %v55_v7, %v1139_v4  ;;  %vm73_vm3 = vcmp.ge.s32.totalorder %v54_v8, %v1139_v4  ;;  %vm72_vm4 = vcmp.ge.s32.totalorder %v53_v9, %v1139_v4  ;;  %vm71_vm5 = vcmp.ge.s32.totalorder %v52_v10, %v1139_v4 }
  0x11   :  { %vm94_vm6 = vcmp.lt.s32.totalorder %v57_v3, %v1147_v11  ;;  %vm93_vm7 = vcmp.lt.s32.totalorder %v56_v6, %v1147_v11  ;;  %vm92_vm8 = vcmp.lt.s32.totalorder %v55_v7, %v1147_v11  ;;  %vm91_vm9 = vcmp.lt.s32.totalorder %v54_v8, %v1147_v11 }
  0x12   :  { %vm1159_vm10 = vmand %vm76_vm0, %vm94_vm6  ;;  %vm90_vm11 = vcmp.lt.s32.totalorder %v53_v9, %v1147_v11  ;;  %vm89_vm12 = vcmp.lt.s32.totalorder %v52_v10, %v1147_v11  ;;  %vm70_vm13 = vcmp.ge.s32.totalorder %v51_v12, %v1139_v4  ;;  %vm88_vm14 = vcmp.lt.s32.totalorder %v51_v12, %v1147_v11 }
  0x13   :  { %v1170_v15 = vsel %vm1159_vm10, 1.0, %v1112_v14  ;;  %929 = vmatpush.msk.msra.mxu0 %vm1159_vm10, %v1113_v16  ;;  %vm1177_vm15 = vmand %vm75_vm1, %vm93_vm7  ;;  %v50_v18 = vadd.s32 64, %v1136_v1  ;;  %v49_v19 = vadd.s32 56, %v1136_v1  ;;  %v1184_v20 = vadd.s32 48, %v1136_v1  ;;  %945 = vmatpush.msk.msra.mxu3 %vm1159_vm10, %v1113_v16 }
  0x14   :  { %v1192_v21 = vsel %vm1177_vm15, 1.0, %v1112_v14  ;;  %vm1198_vm0 = vmand %vm74_vm2, %vm92_vm8  ;;  %v1204_v23 = vsub.f32 %v1170_v15, %v1170_v15  ;;  %v1207_v24 = vadd.s32 40, %v1136_v1  ;;  %v1210_v25 = vadd.s32 32, %v1136_v1 }
  0x15   :  { %930 = vmatpush.msk.msra.mxu0 %vm1177_vm15, %v1113_v16  ;;  %v1218_v26 = vsel %vm1198_vm0, 1.0, %v1112_v14  ;;  %vm1224_vm1 = vmand %vm73_vm3, %vm91_vm9  ;;  %v1230_v28 = vsub.f32 %v1192_v21, %v1192_v21  ;;  %vm69_vm2 = vcmp.ge.s32.totalorder %v50_v18, %v1139_v4  ;;  %vm87_vm6 = vcmp.lt.s32.totalorder %v50_v18, %v1147_v11  ;;  %946 = vmatpush.msk.msra.mxu3 %vm1177_vm15, %v1113_v16 }
  0x16   :  { %v187_v29 = vand.u32 4294901760, %v1204_v23  ;;  %v1241_v30 = vsel %vm1224_vm1, 1.0, %v1112_v14  ;;  %vm1247_vm3 = vmand %vm72_vm4, %vm90_vm11  ;;  %v1253_v32 = vsub.f32 %v1218_v26, %v1218_v26  ;;  %vm68_vm7 = vcmp.ge.s32.totalorder %v49_v19, %v1139_v4  ;;  %288 = vmatpush.msra.mxu2 %v1204_v23 }
  0x17   :  { %931 = vmatpush.msk.msra.mxu0 %vm1198_vm0, %v1113_v16  ;;  %v193_v33 = vand.u32 4294901760, %v1230_v28  ;;  %v1264_v34 = vsel %vm1247_vm3, 1.0, %v1112_v14  ;;  %vm1270_vm4 = vmand %vm71_vm5, %vm89_vm12  ;;  %v1276_v36 = vsub.f32 %v1241_v30, %v1241_v30  ;;  %vm86_vm8 = vcmp.lt.s32.totalorder %v49_v19, %v1147_v11  ;;  %947 = vmatpush.msk.msra.mxu3 %vm1198_vm0, %v1113_v16 }
  0x18   :  { %v188_v37 = vsub.f32 %v1204_v23, %v187_v29  ;;  %v1987_v38 = vand.u32 4294901760, %v1253_v32  ;;  %v1289_v39 = vsel %vm1270_vm4, 1.0, %v1112_v14  ;;  %vm1295_vm5 = vmand %vm70_vm13, %vm88_vm14  ;;  %v1301_v41 = vsub.f32 %v1264_v34, %v1264_v34  ;;  %291 = vmatpush.msra.mxu2 %v1230_v28 }
  0x19   :  { %932 = vmatpush.msk.msra.mxu0 %vm1224_vm1, %v1113_v16  ;;  %v194_v42 = vsub.f32 %v1230_v28, %v193_v33  ;;  %v1985_v43 = vand.u32 4294901760, %v1276_v36  ;;  %v1314_v44 = vsel %vm1295_vm5, 1.0, %v1112_v14  ;;  %vm1320_vm9 = vmand %vm69_vm2, %vm87_vm6  ;;  %v1326_v46 = vsub.f32 %v1289_v39, %v1289_v39  ;;  %948 = vmatpush.msk.msra.mxu3 %vm1224_vm1, %v1113_v16 }
  0x1a   :  { %v2006_v45 = vsel %vm1320_vm9, 4294967295, %v2005_v45  ;;  %v189_v47 = vand.u32 4294901760, %v188_v37  ;;  %v200_v48 = vsub.f32 %v1253_v32, %v1987_v38  ;;  %v1984_v49 = vand.u32 4294901760, %v1301_v41  ;;  %vm1344_vm11 = vmand %vm68_vm7, %vm86_vm8  ;;  %294 = vmatpush.msra.mxu2 %v1253_v32 }
  0x1b   :  { %v1338_v50 = vsel %vm1320_vm9, 1.0, %v1112_v14  ;;  %v2008_v51 = vsel %vm1344_vm11, 4294967295, %v2007_v51  ;;  %v195_v52 = vand.u32 4294901760, %v194_v42  ;;  %933 = vmatpush.msk.msra.mxu0 %vm1247_vm3, %v1113_v16  ;;  %v206_v53 = vsub.f32 %v1276_v36, %v1985_v43  ;;  %949 = vmatpush.msk.msra.mxu3 %vm1247_vm3, %v1113_v16 }
  0x1c   :  { %v1983_v54 = vand.u32 4294901760, %v1326_v46  ;;  %v1359_v55 = vsel %vm1344_vm11, 1.0, %v1112_v14  ;;  %190 = vmatpush.msra.mxu1 %v189_v47  ;;  %v201_v56 = vand.u32 4294901760, %v200_v48  ;;  %v212_v57 = vsub.f32 %v1301_v41, %v1984_v49  ;;  %297 = vmatpush.msra.mxu2 %v1276_v36 }
  0x1d   :  { %v1369_v58 = vsub.f32 %v1314_v44, %v1314_v44  ;;  %vm67_vm12 = vcmp.ge.s32.totalorder %v1184_v20, %v1139_v4  ;;  %934 = vmatpush.msk.msra.mxu0 %vm1270_vm4, %v1113_v16  ;;  %vm85_vm13 = vcmp.lt.s32.totalorder %v1184_v20, %v1147_v11  ;;  %v1384_v60 = vsub.f32 %v1338_v50, %v1338_v50 }
  0x1e   :  { %v218_v59 = vsub.f32 %v1326_v46, %v1983_v54  ;;  %950 = vmatpush.msk.msra.mxu3 %vm1270_vm4, %v1113_v16  ;;  %196 = vmatpush.msra.mxu1 %v195_v52  ;;  %v207_v61 = vand.u32 4294901760, %v206_v53  ;;  %vm1390_vm14 = vmand %vm67_vm12, %vm85_vm13  ;;  %vm66_vm2 = vcmp.ge.s32.totalorder %v1207_v24, %v1139_v4  ;;  %vm84_vm6 = vcmp.lt.s32.totalorder %v1207_v24, %v1147_v11 }
  0x1f   :  { %v1982_v62 = vand.u32 4294901760, %v1369_v58  ;;  %v2010_v63 = vsel %vm1390_vm14, 4294967295, %v2009_v63  ;;  %300 = vmatpush.msra.mxu2 %v1301_v41  ;;  %935 = vmatpush.msk.msra.mxu0 %vm1295_vm5, %v1113_v16  ;;  %v213_v0 = vand.u32 4294901760, %v212_v57  ;;  %v1405_v2 = vsel %vm1390_vm14, 1.0, %v1112_v14  ;;  %vm1408_vm7 = vmand %vm66_vm2, %vm84_vm6 }
  0x20   :  { %v1981_v3 = vand.u32 4294901760, %v1384_v60  ;;  %v1414_v6 = vsub.f32 %v1359_v55, %v1359_v55  ;;  %951 = vmatpush.msk.msra.mxu3 %vm1295_vm5, %v1113_v16  ;;  %202 = vmatpush.msra.mxu1 %v201_v56  ;;  %v1425_v8 = vsel %vm1408_vm7, 1.0, %v1112_v14  ;;  %vm65_vm8 = vcmp.ge.s32.totalorder %v1210_v25, %v1139_v4 }
  0x21   :  { %v224_v7 = vsub.f32 %v1369_v58, %v1982_v62  ;;  %vm83_vm12 = vcmp.lt.s32.totalorder %v1210_v25, %v1147_v11  ;;  %303 = vmatpush.msra.mxu2 %v1326_v46  ;;  %936 = vmatpush.msk.msra.mxu0 %vm1320_vm9, %v1113_v16  ;;  %v219_v9 = vand.u32 4294901760, %v218_v59  ;;  %v1442_v18 = vsub.f32 %v1405_v2, %v1405_v2 }
  0x22   :  { %v1980_v10 = vand.u32 4294901760, %v1414_v6  ;;  %vm1436_vm13 = vmand %vm65_vm8, %vm83_vm12  ;;  %v45_v19 = vadd.s32 24, %v1136_v1  ;;  %952 = vmatpush.msk.msra.mxu3 %vm1320_vm9, %v1113_v16  ;;  %208 = vmatpush.msra.mxu1 %v207_v61  ;;  %v230_v20 = vsub.f32 %v1384_v60, %v1981_v3  ;;  %v1458_v25 = vsub.f32 %v1425_v8, %v1425_v8 }
  0x23   :  { %v1454_v24 = vsel %vm1436_vm13, 1.0, %v1112_v14  ;;  %v44_v37 = vadd.s32 16, %v1136_v1  ;;  %306 = vmatpush.msra.mxu2 %v1369_v58  ;;  %937 = vmatpush.msk.msra.mxu0 %vm1344_vm11, %v1113_v16  ;;  %v225_v42 = vand.u32 4294901760, %v224_v7  ;;  %v1977_v48 = vand.u32 4294901760, %v1442_v18 }
  0x24   :  { %v236_v47 = vsub.f32 %v1414_v6, %v1980_v10  ;;  %vm64_vm2 = vcmp.ge.s32.totalorder %v45_v19, %v1139_v4  ;;  %953 = vmatpush.msk.msra.mxu3 %vm1344_vm11, %v1113_v16  ;;  %214 = vmatpush.msra.mxu1 %v213_v0  ;;  %vm82_vm6 = vcmp.lt.s32.totalorder %v45_v19, %v1147_v11  ;;  %v1978_v52 = vand.u32 4294901760, %v1458_v25 }
  0x25   :  { %vm63_vm8 = vcmp.ge.s32.totalorder %v44_v37, %v1139_v4  ;;  %vm81_vm12 = vcmp.lt.s32.totalorder %v44_v37, %v1147_v11  ;;  %309 = vmatpush.msra.mxu2 %v1384_v60  ;;  %938 = vmatpush.msk.msra.mxu0 %vm1390_vm14, %v1113_v16  ;;  %v242_v53 = vsub.f32 %v1442_v18, %v1977_v48  ;;  %vm1484_vm11 = vmand %vm64_vm2, %vm82_vm6  ;;  %v43_v59 = vadd.s32 8, %v1136_v1 }
  0x26   :  { %v1490_v57 = vsub.f32 %v1454_v24, %v1454_v24  ;;  %954 = vmatpush.msk.msra.mxu3 %vm1390_vm14, %v1113_v16  ;;  %220 = vmatpush.msra.mxu1 %v219_v9  ;;  %v231_v61 = vand.u32 4294901760, %v230_v20  ;;  %v1499_v0 = vsel %vm1484_vm11, 1.0, %v1112_v14  ;;  %vm1501_vm2 = vmand %vm63_vm8, %vm81_vm12  ;;  %vm61_vm6 = vcmp.ge.s32.totalorder %v1136_v1, %v1139_v4 }
  0x27   :  { %vm79_vm9 = vcmp.lt.s32.totalorder %v1136_v1, %v1147_v11  ;;  %312 = vmatpush.msra.mxu2 %v1414_v6  ;;  %939 = vmatpush.msk.msra.mxu0 %vm1408_vm7, %v1113_v16  ;;  %v237_v9 = vand.u32 4294901760, %v236_v47  ;;  %v1516_v19 = vsel %vm1501_vm2, 1.0, %v1112_v14  ;;  %vm62_vm8 = vcmp.ge.s32.totalorder %v43_v59, %v1139_v4  ;;  %v1527_v1 = vld [vmem:[#allocation2] sm:$0xf] }
  0x28   :  { %v1979_v20 = vand.u32 4294901760, %v1490_v57  ;;  %vm1520_vm12 = vmand %vm61_vm6, %vm79_vm9  ;;  %955 = vmatpush.msk.msra.mxu3 %vm1408_vm7, %v1113_v16  ;;  %2021 = vst [vmem:[#allocation11_spill] sm:$0xff] %v1527_v1  ;;  %226 = vmatpush.msra.mxu1 %v225_v42  ;;  %v248_v47 = vsub.f32 %v1458_v25, %v1978_v52  ;;  %vm80_vm14 = vcmp.lt.s32.totalorder %v43_v59, %v1147_v11  ;;  %v243_v42 = vand.u32 4294901760, %v242_v53 }
  0x29   :  { %v1535_v4 = vsub.f32 %v1499_v0, %v1499_v0  ;;  %v1540_v48 = vsel %vm1520_vm12, 1.0, %v1112_v14  ;;  %315 = vmatpush.msra.mxu2 %v1442_v18  ;;  %940 = vmatpush.msk.msra.mxu0 %vm1436_vm13, %v1113_v16  ;;  %vm1549_vm9 = vmand %vm62_vm8, %vm80_vm14  ;;  %v1555_v52 = vsub.f32 %v1516_v19, %v1516_v19  ;;  %v143_v3 = vmul.f32 %v1527_v1, %v1527_v1 }
  0x2a   :  { %v254_v11 = vsub.f32 %v1490_v57, %v1979_v20  ;;  %956 = vmatpush.msk.msra.mxu3 %vm1436_vm13, %v1113_v16  ;;  %232 = vmatpush.msra.mxu1 %v231_v61  ;;  %v1563_v53 = vsel %vm1549_vm9, 1.0, %v1112_v14  ;;  %v1568_v10 = vsub.f32 %v1540_v48, %v1540_v48  ;;  %v249_v62 = vand.u32 4294901760, %v248_v47 }
  0x2b   :  { %v1986_v20 = vand.u32 4294901760, %v1535_v4  ;;  %318 = vmatpush.msra.mxu2 %v1458_v25  ;;  %941 = vmatpush.msk.msra.mxu0 %vm1484_vm11, %v1113_v16  ;;  %v1988_v61 = vand.u32 4294901760, %v1555_v52  ;;  %v1579_v14 = vsub.f32 %v1563_v53, %v1563_v53  ;;  %v1588_v49 = vand.u32 4294901760, %v143_v3 }
  0x2c   :  { %957 = vmatpush.msk.msra.mxu3 %vm1484_vm11, %v1113_v16  ;;  %238 = vmatpush.msra.mxu1 %v237_v9  ;;  %v255_v9 = vand.u32 4294901760, %v254_v11  ;;  %v2024_v23 = vand.u32 4294901760, %v1253_v32  ;;  %vm497_vm14 = vcmask 31744   ;;  %v2029_v17 = vand.u32 4294901760, %v1384_v60 }
  0x2d   :  { %v260_v54 = vsub.f32 %v1535_v4, %v1986_v20  ;;  %321 = vmatpush.msra.mxu2 %v1490_v57  ;;  %942 = vmatpush.msk.msra.mxu0 %vm1501_vm2, %v1113_v16  ;;  %v1989_v43 = vand.u32 4294901760, %v1579_v14  ;;  %v266_v47 = vsub.f32 %v1555_v52, %v1988_v61  ;;  %v277_v20 = vand.u32 4294901760, %v1568_v10 }
  0x2e   :  { %958 = vmatpush.msk.msra.mxu3 %vm1501_vm2, %v1113_v16  ;;  %244 = vmatpush.msra.mxu1 %v243_v42  ;;  %v177_v38 = vsub.f32 %v143_v3, %v1588_v49  ;;  %v547_v28 = vsel %vm497_vm14, %v1170_v15, 0  ;;  %v544_v32 = vsel %vm497_vm14, %v1192_v21, 0  ;;  %v535_v22 = vsel %vm497_vm14, %v1264_v34, 0 }
  0x2f   :  { %324 = vmatpush.msra.mxu2 %v1535_v4  ;;  %943 = vmatpush.msk.msra.mxu0 %vm1549_vm9, %v1113_v16  ;;  %v261_v42 = vand.u32 4294901760, %v260_v54  ;;  %v272_v11 = vsub.f32 %v1579_v14, %v1989_v43  ;;  %v267_v3 = vand.u32 4294901760, %v266_v47  ;;  %v278_v54 = vsub.f32 %v1568_v10, %v277_v20 }
  0x30   :  { %959 = vmatpush.msk.msra.mxu3 %vm1549_vm9, %v1113_v16  ;;  %250 = vmatpush.msra.mxu1 %v249_v62  ;;  %v178_v61 = vand.u32 4294901760, %v177_v38  ;;  %v1650_v13 = vsub.f32 %v544_v32, %v544_v32  ;;  %v2030_v60 = vand.u32 4294901760, %v1414_v6  ;;  %v532_v31 = vsel %vm497_vm14, %v1289_v39, 0 }
  0x31   :  { %327 = vmatpush.msra.mxu2 %v1555_v52  ;;  %944 = vmatpush.msk.msra.mxu0 %vm1520_vm12, %v1113_v16  ;;  %v273_v43 = vand.u32 4294901760, %v272_v11  ;;  %v529_v40 = vsel %vm497_vm14, %v1314_v44, 0  ;;  %v2037_v32 = vand.u32 4294901760, %v1555_v52  ;;  %v2039_v52 = vand.u32 4294901760, %v1579_v14 }
  0x32   :  { %960 = vmatpush.msk.msra.mxu3 %vm1520_vm12, %v1113_v16  ;;  %256 = vmatpush.msra.mxu1 %v255_v9  ;;  %v179_v62 = vsub.f32 %v177_v38, %v178_v61  ;;  %v279_v9 = vand.u32 4294901760, %v278_v54  ;;  %v598_v47 = vand.u32 4294901760, %v1650_v13  ;;  %v523_v5 = vsel %vm497_vm14, %v1359_v55, 0 }
  0x33   :  { %382 = vmatpush.msrb.mxu0 %v187_v29  ;;  %330 = vmatpush.msra.mxu2 %v1579_v14  ;;  %v2025_v29 = vand.u32 4294901760, %v1276_v36  ;;  %v2027_v36 = vand.u32 4294901760, %v1326_v46  ;;  %v520_v56 = vsel %vm497_vm14, %v1405_v2, 0  ;;  %v517_v59 = vsel %vm497_vm14, %v1425_v8, 0 }
  0x34   :  { %375 = vmatmul.f32.vlgmr.msra.gmra.mxu3 %v178_v61  ;;  %262 = vmatpush.msra.mxu1 %v261_v42  ;;  %v180_v1 = vand.u32 4294901760, %v179_v62  ;;  %v2026_v61 = vand.u32 4294901760, %v1301_v41  ;;  %v2031_v62 = vand.u32 4294901760, %v1442_v18  ;;  %v2032_v18 = vand.u32 4294901760, %v1458_v25 }
  0x35   :  { %386 = vmatpush.msrb.mxu0 %v193_v33  ;;  %333 = vmatpush.msra.mxu2 %v1568_v10  ;;  %v541_v33 = vsel %vm497_vm14, %v1218_v26, 0  ;;  %v1717_v25 = vsub.f32 %v532_v31, %v532_v31 }
  0x36   :  { %268 = vmatpush.msra.mxu1 %v267_v3  ;;  %336 = vmatmul.f32.vlgmr.msra.gmra.mxu2 %v177_v38  ;;  %v1648_v38 = vsub.f32 %v547_v28, %v547_v28  ;;  %v1652_v41 = vsub.f32 %v541_v33, %v541_v33 }
  0x37   :  { %390 = vmatpush.msrb.mxu0 %v2024_v23  ;;  %977 = vmatpush.xpose.msk.msrb.mxu2 %vm497_vm14, %v1170_v15  ;;  %v1697_v23 = vsub.f32 %v535_v22, %v535_v22  ;;  %v1792_v22 = vsub.f32 %v520_v56, %v520_v56 }
  0x38   :  { %181 = vmatmul.f32.vlgmr.msra.gmra.mxu0 %v180_v1  ;;  %274 = vmatpush.msra.mxu1 %v273_v43  ;;  %v538_v43 = vsel %vm497_vm14, %v1241_v30, 0  ;;  %v2028_v1 = vand.u32 4294901760, %v1369_v58  ;;  %v592_v46 = vand.u32 4294901760, %v1648_v38  ;;  %v599_v58 = vsub.f32 %v1650_v13, %v598_v47 }
  0x39   :  { %394 = vmatpush.msrb.mxu0 %v2025_v29  ;;  %v604_v11 = vand.u32 4294901760, %v1652_v41  ;;  %v1677_v3 = vsub.f32 %v538_v43, %v538_v43  ;;  %v2033_v29 = vand.u32 4294901760, %v1490_v57  ;;  %v616_v28 = vand.u32 4294901760, %v1697_v23 }
  0x3a   :  { %280 = vmatpush.msra.mxu1 %v279_v9  ;;  %v593_v42 = vsub.f32 %v1648_v38, %v592_v46  ;;  %v600_v27 = vand.u32 4294901760, %v599_v58  ;;  %v2035_v57 = vand.u32 4294901760, %v1535_v4  ;;  %v1737_v4 = vsub.f32 %v529_v40, %v529_v40 }
  0x3b   :  { %398 = vmatpush.msrb.mxu0 %v2026_v61  ;;  %282 = vmatmul.f32.vlgmr.msra.gmra.mxu1 %v1588_v49  ;;  %v605_v9 = vsub.f32 %v1652_v41, %v604_v11  ;;  %v610_v6 = vand.u32 4294901760, %v1677_v3 }
  0x3c   :  { %961 = vmatpush.msk.msrb.mxu1 %vm1159_vm10, %v1113_v16  ;;  %978 = vmatpush.xpose.msk.msrb.mxu2 %vm497_vm14, %v1192_v21  ;;  %v594_v54 = vand.u32 4294901760, %v593_v42  ;;  %vm2034_vm10 = vnez %v2006_v45  ;;  %v617_v45 = vsub.f32 %v1697_v23, %v616_v28 }
  0x3d   :  { %402 = vmatpush.msrb.mxu0 %v2027_v36  ;;  %v606_v61 = vand.u32 4294901760, %v605_v9  ;;  %v611_v35 = vsub.f32 %v1677_v3, %v610_v6  ;;  %v622_v36 = vand.u32 4294901760, %v1717_v25 }
  0x3e   :  { %962 = vmatpush.msk.msrb.mxu1 %vm1177_vm15, %v1113_v16  ;;  %595 = vmatpush.xpose.msrb.mxu3 %v594_v54  ;;  %vm2036_vm15 = vnez %v2008_v51  ;;  %v526_v51 = vsel %vm497_vm14, %v1338_v50, 0  ;;  %v618_v43 = vand.u32 4294901760, %v617_v45  ;;  %v1809_v54 = vsub.f32 %v517_v59, %v517_v59 }
  0x3f   :  { %406 = vmatpush.msrb.mxu0 %v2028_v1  ;;  %v612_v33 = vand.u32 4294901760, %v611_v35  ;;  %v628_v1 = vand.u32 4294901760, %v1737_v4  ;;  %v1757_v14 = vsub.f32 %v526_v51, %v526_v51 }
  0x40   :  { %963 = vmatpush.msk.msrb.mxu1 %vm1198_vm0, %v1113_v16  ;;  %979 = vmatpush.xpose.msk.msrb.mxu2 %vm497_vm14, %v1218_v26  ;;  %vm2038_vm0 = vnez %v2010_v63  ;;  %v623_v63 = vsub.f32 %v1717_v25, %v622_v36  ;;  %v652_v9 = vand.u32 4294901760, %v1809_v54 }
  0x41   :  { %410 = vmatpush.msrb.mxu0 %v2029_v17  ;;  %v629_v12 = vsub.f32 %v1737_v4, %v628_v1  ;;  %v1775_v17 = vsub.f32 %v523_v5, %v523_v5 }
  0x42   :  { %964 = vmatpush.msk.msrb.mxu1 %vm1224_vm1, %v1113_v16  ;;  %601 = vmatpush.xpose.msrb.mxu3 %v600_v27  ;;  %v624_v10 = vand.u32 4294901760, %v623_v63 }
  0x43   :  { %414 = vmatpush.msrb.mxu0 %v2030_v60  ;;  %v630_v42 = vand.u32 4294901760, %v629_v12  ;;  %v640_v7 = vand.u32 4294901760, %v1775_v17  ;;  %v502_v12 = vsel %vm497_vm14, %v1540_v48, 0 }
  0x44   :  { %965 = vmatpush.msk.msrb.mxu1 %vm1247_vm3, %v1113_v16  ;;  %980 = vmatpush.xpose.msk.msrb.mxu2 %vm497_vm14, %v1241_v30  ;;  %v681_v59 = vsub.f32 %v502_v12, %v502_v12 }
  0x45   :  { %418 = vmatpush.msrb.mxu0 %v2031_v62  ;;  %v641_v37 = vsub.f32 %v1775_v17, %v640_v7 }
  0x46   :  { %966 = vmatpush.msk.msrb.mxu1 %vm1270_vm4, %v1113_v16  ;;  %607 = vmatpush.xpose.msrb.mxu3 %v606_v61  ;;  %v653_v61 = vsub.f32 %v1809_v54, %v652_v9 }
  0x47   :  { %422 = vmatpush.msrb.mxu0 %v2032_v18  ;;  %v642_v62 = vand.u32 4294901760, %v641_v37  ;;  %v511_v18 = vsel %vm497_vm14, %v1499_v0, 0 }
  0x48   :  { %967 = vmatpush.msk.msrb.mxu1 %vm1295_vm5, %v1113_v16  ;;  %981 = vmatpush.xpose.msk.msrb.mxu2 %vm497_vm14, %v1264_v34  ;;  %v1835_v40 = vsub.f32 %v511_v18, %v511_v18 }
  0x49   :  { %426 = vmatpush.msrb.mxu0 %v2033_v29 }
  0x4a   :  { %968 = vmatpush.msk.msrb.mxu1 %vm2034_vm10, %v1113_v16  ;;  %613 = vmatpush.xpose.msrb.mxu3 %v612_v33  ;;  %v664_v45 = vand.u32 4294901760, %v1835_v40 }
  0x4b   :  { %430 = vmatpush.msrb.mxu0 %v2035_v57  ;;  %v508_v57 = vsel %vm497_vm14, %v1516_v19, 0 }
  0x4c   :  { %969 = vmatpush.msk.msrb.mxu1 %vm2036_vm15, %v1113_v16  ;;  %982 = vmatpush.xpose.msk.msrb.mxu2 %vm497_vm14, %v1289_v39  ;;  %v1848_v51 = vsub.f32 %v508_v57, %v508_v57  ;;  %v665_v63 = vsub.f32 %v1835_v40, %v664_v45 }
  0x4d   :  { %434 = vmatpush.msrb.mxu0 %v2037_v32  ;;  %v654_v32 = vand.u32 4294901760, %v653_v61 }
  0x4e   :  { %970 = vmatpush.msk.msrb.mxu1 %vm2038_vm0, %v1113_v16  ;;  %619 = vmatpush.xpose.msrb.mxu3 %v618_v43  ;;  %v670_v5 = vand.u32 4294901760, %v1848_v51  ;;  %v666_v56 = vand.u32 4294901760, %v665_v63 }
  0x4f   :  { %438 = vmatpush.msrb.mxu0 %v2039_v52  ;;  %v505_v52 = vsel %vm497_vm14, %v1563_v53, 0 }
  0x50   :  { %971 = vmatpush.msk.msrb.mxu1 %vm1408_vm7, %v1113_v16  ;;  %983 = vmatpush.xpose.msk.msrb.mxu2 %vm497_vm14, %v1314_v44 }
  0x51   :  { %442 = vmatpush.msrb.mxu0 %v277_v20  ;;  %v634_v20 = vand.u32 4294901760, %v1757_v14 }
  0x52   :  { %972 = vmatpush.msk.msrb.mxu1 %vm1436_vm13, %v1113_v16  ;;  %444 = vmatmul.f32.vlgmr.msrb.gmra.mxu0 %v1588_v49 }
  0x53   :  { %693 = vmatpush.xpose.msra.mxu0 %v1648_v38  ;;  %625 = vmatpush.xpose.msrb.mxu3 %v624_v10  ;;  %v635_v58 = vsub.f32 %v1757_v14, %v634_v20  ;;  %v1861_v10 = vsub.f32 %v505_v52, %v505_v52 }
  0x54   :  { %973 = vmatpush.msk.msrb.mxu1 %vm1484_vm11, %v1113_v16  ;;  %984 = vmatpush.xpose.msk.msrb.mxu2 %vm497_vm14, %v1338_v50 }
  0x55   :  { %v636_v60 = vand.u32 4294901760, %v635_v58  ;;  %v676_v58 = vand.u32 4294901760, %v1861_v10 }
  0x56   :  { %974 = vmatpush.msk.msrb.mxu1 %vm1501_vm2, %v1113_v16 }
  0x57   :  { %696 = vmatpush.xpose.msra.mxu0 %v1650_v13  ;;  %631 = vmatpush.xpose.msrb.mxu3 %v630_v42  ;;  %v671_v42 = vsub.f32 %v1848_v51, %v670_v5  ;;  %v677_v37 = vsub.f32 %v1861_v10, %v676_v58 }
  0x58   :  { %975 = vmatpush.msk.msrb.mxu1 %vm1549_vm9, %v1113_v16  ;;  %985 = vmatpush.xpose.msk.msrb.mxu2 %vm497_vm14, %v1359_v55 }
  0x5a   :  { %976 = vmatpush.msk.msrb.mxu1 %vm1520_vm12, %v1113_v16  ;;  %v646_v16 = vand.u32 4294901760, %v1792_v22 }
  0x5b   :  { %481 = vmatmul.f32.vlgmr.msrb.gmra.mxu1 %v1588_v49  ;;  %699 = vmatpush.xpose.msra.mxu0 %v1652_v41  ;;  %v514_v49 = vsel %vm497_vm14, %v1454_v24, 0 }
  0x5c   :  { %993 = vmatpush.xpose.msk.msra.mxu1 %vm497_vm14, %v1170_v15  ;;  %986 = vmatpush.xpose.msk.msrb.mxu2 %vm497_vm14, %v1405_v2  ;;  %v647_v27 = vsub.f32 %v1792_v22, %v646_v16  ;;  %v1822_v31 = vsub.f32 %v514_v49, %v514_v49  ;;  %v682_v49 = vand.u32 4294901760, %v681_v59 }
  0x5d   :  { %637 = vmatpush.xpose.msrb.mxu3 %v636_v60  ;;  %v672_v60 = vand.u32 4294901760, %v671_v42 }
  0x5e   :  { %v648_v29 = vand.u32 4294901760, %v647_v27  ;;  %v658_v35 = vand.u32 4294901760, %v1822_v31  ;;  %v683_v27 = vsub.f32 %v681_v59, %v682_v49 }
  0x5f   :  { %702 = vmatpush.xpose.msra.mxu0 %v1677_v3 }
  0x60   :  { %994 = vmatpush.xpose.msk.msra.mxu1 %vm497_vm14, %v1192_v21  ;;  %987 = vmatpush.xpose.msk.msrb.mxu2 %vm497_vm14, %v1425_v8  ;;  %v659_v33 = vsub.f32 %v1822_v31, %v658_v35  ;;  %v684_v18 = vand.u32 4294901760, %v683_v27 }
  0x61   :  { %643 = vmatpush.xpose.msrb.mxu3 %v642_v62  ;;  %v678_v62 = vand.u32 4294901760, %v677_v37 }
  0x62   :  { %v660_v43 = vand.u32 4294901760, %v659_v33 }
  0x63   :  { %705 = vmatpush.xpose.msra.mxu0 %v1697_v23 }
  0x64   :  { %995 = vmatpush.xpose.msk.msra.mxu1 %vm497_vm14, %v1218_v26  ;;  %988 = vmatpush.xpose.msk.msrb.mxu2 %vm497_vm14, %v1454_v24 }
  0x65   :  { %649 = vmatpush.xpose.msrb.mxu3 %v648_v29  ;;  %v2040_v29 = vld [vmem:[#allocation11_spill] sm:$0xff] }
  0x67   :  { %708 = vmatpush.xpose.msra.mxu0 %v1717_v25 }
  0x68   :  { %996 = vmatpush.xpose.msk.msra.mxu1 %vm497_vm14, %v1241_v30  ;;  %989 = vmatpush.xpose.msk.msrb.mxu2 %vm497_vm14, %v1499_v0 }
  0x69   :  { %655 = vmatpush.xpose.msrb.mxu3 %v654_v32 }
  0x6b   :  { %711 = vmatpush.xpose.msra.mxu0 %v1737_v4 }
  0x6c   :  { %997 = vmatpush.xpose.msk.msra.mxu1 %vm497_vm14, %v1264_v34  ;;  %990 = vmatpush.xpose.msk.msrb.mxu2 %vm497_vm14, %v1516_v19 }
  0x6d   :  { %661 = vmatpush.xpose.msrb.mxu3 %v660_v43 }
  0x6f   :  { %714 = vmatpush.xpose.msra.mxu0 %v1757_v14 }
  0x70   :  { %998 = vmatpush.xpose.msk.msra.mxu1 %vm497_vm14, %v1289_v39  ;;  %991 = vmatpush.xpose.msk.msrb.mxu2 %vm497_vm14, %v1563_v53 }
  0x71   :  { %667 = vmatpush.xpose.msrb.mxu3 %v666_v56 }
  0x73   :  { %717 = vmatpush.xpose.msra.mxu0 %v1775_v17 }
  0x74   :  { %999 = vmatpush.xpose.msk.msra.mxu1 %vm497_vm14, %v1314_v44  ;;  %992 = vmatpush.xpose.msk.msrb.mxu2 %vm497_vm14, %v1540_v48 }
  0x75   :  { %673 = vmatpush.xpose.msrb.mxu3 %v672_v60 }
  0x77   :  { %720 = vmatpush.xpose.msra.mxu0 %v1792_v22  ;;  %v891_v22 = vld [vmem:[#allocation5] sm:$0xff] }
  0x78   :  { %1000 = vmatpush.xpose.msk.msra.mxu1 %vm497_vm14, %v1338_v50  ;;  %787 = vmatpush.xpose.msra.mxu2 %v592_v46 }
  0x79   :  { %679 = vmatpush.xpose.msrb.mxu3 %v678_v62 }
  0x7b   :  { %723 = vmatpush.xpose.msra.mxu0 %v1809_v54 }
  0x7c   :  { %1001 = vmatpush.xpose.msk.msra.mxu1 %vm497_vm14, %v1359_v55  ;;  %791 = vmatpush.xpose.msra.mxu2 %v598_v47 }
  0x7d   :  { %685 = vmatpush.xpose.msrb.mxu3 %v684_v18 }
  0x7f   :  { %726 = vmatpush.xpose.msra.mxu0 %v1822_v31  ;;  %v892_v31 = vperm.slane %v891_v22, 0 }
  0x80   :  { %1002 = vmatpush.xpose.msk.msra.mxu1 %vm497_vm14, %v1405_v2  ;;  %795 = vmatpush.xpose.msra.mxu2 %v604_v11 }
  0x81   :  { %1009 = vmatpush.xpose.msk.msra.mxu3 %vm497_vm14, %v1170_v15 }
  0x83   :  { %729 = vmatpush.xpose.msra.mxu0 %v1835_v40 }
  0x84   :  { %1003 = vmatpush.xpose.msk.msra.mxu1 %vm497_vm14, %v1425_v8  ;;  %799 = vmatpush.xpose.msra.mxu2 %v610_v6 }
  0x85   :  { %1010 = vmatpush.xpose.msk.msra.mxu3 %vm497_vm14, %v1192_v21 }
  0x87   :  { %732 = vmatpush.xpose.msra.mxu0 %v1848_v51 }
  0x88   :  { %1004 = vmatpush.xpose.msk.msra.mxu1 %vm497_vm14, %v1454_v24  ;;  %803 = vmatpush.xpose.msra.mxu2 %v616_v28 }
  0x89   :  { %1011 = vmatpush.xpose.msk.msra.mxu3 %vm497_vm14, %v1218_v26 }
  0x8b   :  { %735 = vmatpush.xpose.msra.mxu0 %v1861_v10 }
  0x8c   :  { %1005 = vmatpush.xpose.msk.msra.mxu1 %vm497_vm14, %v1499_v0  ;;  %807 = vmatpush.xpose.msra.mxu2 %v622_v36 }
  0x8d   :  { %1012 = vmatpush.xpose.msk.msra.mxu3 %vm497_vm14, %v1241_v30 }
  0x8f   :  { %738 = vmatpush.xpose.msra.mxu0 %v681_v59 }
  0x90   :  { %1006 = vmatpush.xpose.msk.msra.mxu1 %vm497_vm14, %v1516_v19  ;;  %811 = vmatpush.xpose.msra.mxu2 %v628_v1 }
  0x91   :  { %1013 = vmatpush.xpose.msk.msra.mxu3 %vm497_vm14, %v1264_v34 }
  0x94   :  { %1007 = vmatpush.xpose.msk.msra.mxu1 %vm497_vm14, %v1563_v53  ;;  %815 = vmatpush.xpose.msra.mxu2 %v634_v20 }
  0x95   :  { %1014 = vmatpush.xpose.msk.msra.mxu3 %vm497_vm14, %v1289_v39 }
  0x98   :  { %1008 = vmatpush.xpose.msk.msra.mxu1 %vm497_vm14, %v1540_v48  ;;  %819 = vmatpush.xpose.msra.mxu2 %v640_v7 }
  0x99   :  { %1015 = vmatpush.xpose.msk.msra.mxu3 %vm497_vm14, %v1314_v44 }
  0x9c   :  { %823 = vmatpush.xpose.msra.mxu2 %v646_v16 }
  0x9d   :  { %1016 = vmatpush.xpose.msk.msra.mxu3 %vm497_vm14, %v1338_v50 }
  0xa0   :  { %827 = vmatpush.xpose.msra.mxu2 %v652_v9 }
  0xa1   :  { %1017 = vmatpush.xpose.msk.msra.mxu3 %vm497_vm14, %v1359_v55 }
  0xa4   :  { %831 = vmatpush.xpose.msra.mxu2 %v658_v35 }
  0xa5   :  { %1018 = vmatpush.xpose.msk.msra.mxu3 %vm497_vm14, %v1405_v2 }
  0xa8   :  { %835 = vmatpush.xpose.msra.mxu2 %v664_v45 }
  0xa9   :  { %1019 = vmatpush.xpose.msk.msra.mxu3 %vm497_vm14, %v1425_v8 }
  0xac   :  { %839 = vmatpush.xpose.msra.mxu2 %v670_v5 }
  0xad   :  { %1020 = vmatpush.xpose.msk.msra.mxu3 %vm497_vm14, %v1454_v24 }
  0xb0   :  { %843 = vmatpush.xpose.msra.mxu2 %v676_v58 }
  0xb1   :  { %1021 = vmatpush.xpose.msk.msra.mxu3 %vm497_vm14, %v1499_v0 }
  0xb4   :  { %847 = vmatpush.xpose.msra.mxu2 %v682_v49 }
  0xb5   :  { %1022 = vmatpush.xpose.msk.msra.mxu3 %vm497_vm14, %v1516_v19  ;;  %v182_v21 = vpop.f32.mrf.mxu0 }
  0xb7   :  { %v376_v39 = vpop.f32.mrf.mxu3 }
  0xb8   :  { %v283_v15 = vpop.f32.mrf.mxu1 }
  0xb9   :  { %1023 = vmatpush.xpose.msk.msra.mxu3 %vm497_vm14, %v1563_v53  ;;  %v284_v26 = vadd.f32 %v283_v15, %v182_v21  ;;  %v337_v30 = vpop.f32.mrf.mxu2 }
  0xbb   :  { %v338_v34 = vadd.f32 %v337_v30, %v284_v26 }
  0xbd   :  { %1024 = vmatpush.xpose.msk.msra.mxu3 %vm497_vm14, %v1540_v48  ;;  %v377_v44 = vadd.f32 %v376_v39, %v338_v34 }
  0xcf   :  { %v445_v50 = vpop.f32.mrf.mxu0 }
  0xd0   :  { %v446_v55 = vadd.f32 %v445_v50, %v377_v44 }
  0xd8   :  { %v482_v2 = vpop.f32.mrf.mxu1 }
  0xd9   :  { %v483_v8 = vadd.f32 %v482_v2, %v446_v55 }
  0xdb   :  { %v485_v24 = vmul.f32 0.03125, %v483_v8 }
  0xdd   :  { %v486_v0 = vadd.f32 1e-05, %v485_v24 }
  0xdf   :  { %1030 = vrsqrt.f32 %v486_v0  ;;  %vm493_vm3 = vweird.f32 %v486_v0 }
  0xe5   :  { %v1031_v19 = vpop.eup %1030 }
  0xe6   :  { %v488_v38 = vmul.f32 %v1031_v19, %v486_v0  ;;  %vm494_vm1 = vweird.f32 %v1031_v19 }
  0xe7   :  { %vm495_vm4 = vmor %vm493_vm3, %vm494_vm1 }
  0xe8   :  { %v489_v53 = vmul.f32 %v1031_v19, %v488_v38 }
  0xea   :  { %v490_v13 = vmul.f32 0.5, %v489_v53 }
  0xec   :  { %v491_v41 = vsub.f32 1.5, %v490_v13 }
  0xee   :  { %v492_v48 = vmul.f32 %v1031_v19, %v491_v41 }
  0xf0   :  { %v496_v46 = vsel %vm495_vm4, %v1031_v19, %v492_v48 }
  0xf1   :  { %v499_v47 = vsel %vm497_vm14, %v496_v46, 0 }
  0xf2   :  { %v581_v11 = vand.u32 4294901760, %v499_v47 }
  0xf4   :  { %687 = vmatmul.f32.vlgmr.msrb.gmra.mxu3 %v581_v11  ;;  %v582_v3 = vsub.f32 %v499_v47, %v581_v11 }
  0xf6   :  { %741 = vmatmul.f32.vlgmr.msra.gmra.mxu0 %v582_v3  ;;  %v583_v6 = vand.u32 4294901760, %v582_v3 }
  0xf8   :  { %780 = vmatmul.f32.vlgmr.msra.gmra.mxu1 %v583_v6  ;;  %v584_v23 = vsub.f32 %v582_v3, %v583_v6 }
  0xfa   :  { %v585_v28 = vand.u32 4294901760, %v584_v23 }
  0xfc   :  { %586 = vmatmul.f32.vlgmr.msrb.gmra.mxu2 %v585_v28  ;;  %886 = vmatmul.f32.vlgmr.msra.gmra.mxu3 %v581_v11 }
 0x104   :  { %849 = vmatmul.f32.vlgmr.msra.gmra.mxu2 %v581_v11 }
 0x173   :  { %v742_v1 = vpop.f32.mrf.mxu0 }
 0x175   :  { %v781_v20 = vpop.f32.mrf.mxu1 }
 0x177   :  { %v688_v25 = vpop.f32.mrf.mxu3 }
 0x17f   :  { %v587_v36 = vpop.f32.mrf.mxu2  ;;  %v887_v54 = vpop.f32.mrf.mxu3 }
 0x180   :  { %v689_v4 = vadd.f32 %v688_v25, %v587_v36 }
 0x182   :  { %v743_v14 = vadd.f32 %v742_v1, %v689_v4 }
 0x184   :  { %v782_v17 = vadd.f32 %v781_v20, %v743_v14 }
 0x187   :  { %v850_v7 = vpop.f32.mrf.mxu2 }
 0x188   :  { %v851_v16 = vadd.f32 %v850_v7, %v782_v17 }
 0x18a   :  { %v888_v9 = vadd.f32 %v887_v54, %v851_v16 }
 0x18c   :  { %v890_v61 = vmul.f32 %v888_v9, %v2040_v29 }
 0x18e   :  { %v893_v35 = vmul.f32 %v892_v31, %v890_v61 }
 0x190   :  { %894 = vst [vmem:[#allocation7] sm:$0xf] %v893_v35 }
 0x191   :  { %905 = dma.vmem_to_hbm [thread:$0]  %s901_s1, 64, %s903_s21, [#allocation4]  }
 0x192   :  { %1108 = dma.done.wait [#allocation4], 64  }
 0x193   :  { %1109 = vsyncadd [#allocation4], 4294967232 }
 0x194   :  { %910 = vsyncpa [#allocation3], 1 }
 0x195   :  { %911 = vsyncpa [#allocation6], 1 }
 0x196   :  { %912 = vsyncpa [#allocation4], 1 }

</bundles_post_ra>
